<compile_context>
chip_gen: v6e
topology: v6e:2x2x1
jax: 0.10.0
libtpu: 0.0.40
codegen_flags: <defaults>
</compile_context>

<pallas_src>
import functools

import jax
import jax.numpy as jnp
from jax import lax
from jax.experimental import pallas as pl
from jax.experimental.pallas import tpu as pltpu

EMBED_SIZE = 32           # embed_size passed to Encoder(__init__)
BACKBONE_FEATURES = 2048  # inception.fc.in_features
DROPOUT_P = 0.3
_DROP_THRESHOLD = int(DROPOUT_P * (1 << 23))   # integer-space keep test
_INV_KEEP = 1.0 / (1.0 - DROPOUT_P)


def _encoder_kernel(seed_ref, x_ref, w_ref, b_ref, out_ref, *, apply_dropout):
    """Fused: global-avg-pool -> folded linear (-> embed, padded) -> ReLU -> dropout."""
    # ---- backbone stand-in: global average pool over spatial (lane) axis ----
    # x_ref: (TN, C, H*W) f32 -> pooled (TN, C)
    pooled = jnp.mean(x_ref[...], axis=-1)

    # ---- folded stem@fc linear: (TN, C) @ (C, E_pad), bf16 MXU, f32 accumulate ----
    act = jnp.dot(pooled.astype(w_ref.dtype), w_ref[...],
                  preferred_element_type=jnp.float32) + b_ref[...]

    # ---- ReLU ----
    act = jnp.maximum(act, 0.0)

    if apply_dropout:
        # ---- Dropout(p=0.3), training mode, inverted scaling ----
        # Counter-based integer hash PRNG (lowers both under Mosaic and in
        # interpret mode; pltpu.prng_* has no CPU/interpret lowering).
        # Seed is folded with program_id so every batch tile gets a distinct mask.
        shape = act.shape
        seed_u = seed_ref[0].astype(jnp.uint32)
        pid_u = pl.program_id(0).astype(jnp.uint32)
        base = seed_u + pid_u * jnp.uint32(0x9E3779B9)
        r = lax.broadcasted_iota(jnp.int32, shape, 0).astype(jnp.uint32)
        c = lax.broadcasted_iota(jnp.int32, shape, 1).astype(jnp.uint32)
        h = base + r * jnp.uint32(0x85EBCA6B) + c * jnp.uint32(0xC2B2AE35)
        h = h ^ (h >> 16)
        h = h * jnp.uint32(0x7FEB352D)
        h = h ^ (h >> 15)
        h = h * jnp.uint32(0x846CA68B)
        h = h ^ (h >> 16)
        # Integer-threshold keep test (no u32->f32 convert, no extra f32 mul).
        keep = (h & jnp.uint32(0x7FFFFF)) >= jnp.uint32(_DROP_THRESHOLD)
        act = jnp.where(keep, act * _INV_KEEP, 0.0)

    out_ref[...] = act


def _pick_batch_tile(n, target):
    """Largest batch tile <= target that divides n and keeps the out block legal
    (second-minor dim multiple of 8 or equal to the full batch)."""
    if n <= target:
        return n
    for tn in range(min(target, n), 0, -1):
        if n % tn == 0 and tn % 8 == 0:
            return tn
    return n  # fall back to whole batch (block == full dim is always legal)


@functools.partial(jax.jit, static_argnames=("embed_size", "training", "batch_tile"))
def encoder_forward(image, wstem, bstem, wfc, bfc, seed, *,
                    embed_size, training=True, batch_tile=8):
    """image: (N, C, H, W) float32 -> (N, embed_size) float32."""
    n, c, h, w = image.shape
    hw = h * w
    x = image.reshape(n, c, hw)

    # Fold the linear backbone stand-in into inception.fc:
    #   pooled @ Wstem @ Wfc + (bstem @ Wfc + bfc) == pooled @ Wcomb + bcomb
    # This removes the 2048-d intermediate and ~280 KB of per-call weight HBM
    # traffic from the kernel.  (Valid only while the stand-in is purely linear.)
    w_comb = wstem @ wfc            # (C, embed)
    b_comb = bstem @ wfc + bfc      # (embed,)

    # Pad the feature axis to a lane-dense multiple of 128 -> unmasked vector
    # stores in the kernel; the wrapper slices back to embed_size.
    e_pad = max(128, ((embed_size + 127) // 128) * 128)
    w_pad = jnp.zeros((c, e_pad), jnp.float32).at[:, :embed_size].set(w_comb)
    b_pad = jnp.zeros((1, e_pad), jnp.float32).at[:, :embed_size].set(b_comb)
    w_pad = w_pad.astype(jnp.bfloat16)   # bf16 MXU path; accumulate stays f32

    # Batch-tiled grid: automatic double buffering, VMEM bounded per step
    # (tile = TN*C*H*W*4 B; TN=8 keeps real Inception inputs well under the
    # v7x 32 MiB default scoped-VMEM limit), and shardable across v7x's 2 TCs.
    tn = _pick_batch_tile(n, batch_tile)
    grid = (n // tn,)

    kernel = functools.partial(_encoder_kernel, apply_dropout=training)

    out = pl.pallas_call(
        kernel,
        out_shape=jax.ShapeDtypeStruct((n, e_pad), jnp.float32),
        grid_spec=pltpu.PrefetchScalarGridSpec(
            num_scalar_prefetch=1,          # seed lives in SMEM
            grid=grid,
            in_specs=[
                pl.BlockSpec((tn, c, hw), lambda i, seed_ref: (i, 0, 0)),
                pl.BlockSpec((c, e_pad), lambda i, seed_ref: (0, 0)),
                pl.BlockSpec((1, e_pad), lambda i, seed_ref: (0, 0)),
            ],
            out_specs=pl.BlockSpec((tn, e_pad), lambda i, seed_ref: (i, 0)),
        ),
        compiler_params=pltpu.CompilerParams(
            dimension_semantics=("parallel",)),
    )(seed, x, w_pad, b_pad)

    return out[:, :embed_size]


def init_params(key, in_channels, embed_size):
    k1, k2, k3, k4 = jax.random.split(key, 4)
    # deterministic stand-in for the pretrained backbone's final projection
    wstem = jax.random.normal(k1, (in_channels, BACKBONE_FEATURES),
                              jnp.float32) * 0.05
    bstem = jax.random.normal(k2, (BACKBONE_FEATURES,), jnp.float32) * 0.01
    # the Encoder's own Linear(2048, embed_size)
    wfc = jax.random.normal(k3, (BACKBONE_FEATURES, embed_size),
                            jnp.float32) * 0.02
    bfc = jax.random.normal(k4, (embed_size,), jnp.float32) * 0.01
    return wstem, bstem, wfc, bfc


if __name__ == "__main__":
    key = jax.random.PRNGKey(0)
    k_img, k_par = jax.random.split(key)

    # small image batch: batch=2, RGB channels=3, spatial 16x16 (NCHW)
    image = jax.random.normal(k_img, (2, 3, 16, 16), jnp.float32)
    wstem, bstem, wfc, bfc = init_params(k_par, in_channels=3,
                                         embed_size=EMBED_SIZE)
    seed = jnp.array([0], dtype=jnp.int32)

    out = encoder_forward(image, wstem, bstem, wfc, bfc, seed,
                          embed_size=EMBED_SIZE, training=True)
    jax.block_until_ready(out)

    assert out.shape == (2, EMBED_SIZE)
    assert out.dtype == jnp.float32
    print("KERNEL_OK")
</pallas_src>

<mosaic_0001>
module attributes {stable_mosaic.version = 11 : i64} {
  func.func @_encoder_kernel(%arg0: i32, %arg1: memref<1xi32, #tpu.memory_space<smem>>, %arg2: memref<2x3x256xf32, #tpu.memory_space<vmem>>, %arg3: memref<3x128xbf16, #tpu.memory_space<vmem>>, %arg4: memref<1x128xf32, #tpu.memory_space<vmem>>, %arg5: memref<2x128xf32, #tpu.memory_space<vmem>>) attributes {dimension_semantics = [#tpu.dimension_semantics<parallel>], iteration_bounds = array<i64: 1>, scalar_prefetch = 1 : i64, scratch_operands = 0 : i64, tpu.core_type = #tpu.core_type<tc>, window_params = [{transform_indices = @transform_0, window_bounds = array<i64: 2, 3, 256>}, {pipeline_mode = #tpu.pipeline_mode<synchronous>, transform_indices = @transform_1, window_bounds = array<i64: 3, 128>}, {pipeline_mode = #tpu.pipeline_mode<synchronous>, transform_indices = @transform_2, window_bounds = array<i64: 1, 128>}, {transform_indices = @transform_3, window_bounds = array<i64: 2, 128>}]} {
    %c0 = arith.constant 0 : index
    %c0_0 = arith.constant 0 : index
    %c0_1 = arith.constant 0 : index
    %0 = vector.load %arg2[%c0, %c0_0, %c0_1] : memref<2x3x256xf32, #tpu.memory_space<vmem>>, vector<2x3x256xf32>
    %cst = arith.constant dense<0.000000e+00> : vector<2x3xf32>
    %1 = vector.multi_reduction <add>, %0, %cst [2] : vector<2x3x256xf32> to vector<2x3xf32>
    %cst_2 = arith.constant 2.560000e+02 : f32
    %2 = vector.broadcast %cst_2 : f32 to vector<2x3xf32>
    %3 = arith.divf %1, %2 : vector<2x3xf32>
    %4 = arith.truncf %3 : vector<2x3xf32> to vector<2x3xbf16>
    %c0_3 = arith.constant 0 : index
    %c0_4 = arith.constant 0 : index
    %5 = vector.load %arg3[%c0_3, %c0_4] : memref<3x128xbf16, #tpu.memory_space<vmem>>, vector<3x128xbf16>
    %cst_5 = arith.constant dense<0.000000e+00> : vector<2x128xf32>
    %6 = tpu.matmul %4, %5, %cst_5 {dimension_numbers = #tpu.dot_dimension_numbers<[1], [0], [0], [1], [0, 0, 1, 1], [], []>} : vector<2x3xbf16>, vector<3x128xbf16>, vector<2x128xf32> -> vector<2x128xf32>
    %c0_6 = arith.constant 0 : index
    %c0_7 = arith.constant 0 : index
    %7 = vector.load %arg4[%c0_6, %c0_7] : memref<1x128xf32, #tpu.memory_space<vmem>>, vector<1x128xf32>
    %8 = vector.broadcast %7 : vector<1x128xf32> to vector<2x128xf32>
    %9 = arith.addf %6, %8 : vector<2x128xf32>
    %cst_8 = arith.constant 0.000000e+00 : f32
    %10 = vector.broadcast %cst_8 : f32 to vector<2x128xf32>
    %11 = arith.maximumf %9, %10 : vector<2x128xf32>
    %c0_9 = arith.constant 0 : index
    %12 = memref.load %arg1[%c0_9] : memref<1xi32, #tpu.memory_space<smem>>
    %c-1640531527_i32 = arith.constant -1640531527 : i32
    %13 = arith.muli %arg0, %c-1640531527_i32 : i32
    %14 = arith.addi %12, %13 : i32
    %15 = tpu.iota {dimensions = array<i32: 0>} : vector<2x128xi32>
    %16 = tpu.iota {dimensions = array<i32: 1>} : vector<2x128xi32>
    %c-2048144789_i32 = arith.constant -2048144789 : i32
    %17 = vector.broadcast %c-2048144789_i32 : i32 to vector<2x128xi32>
    %18 = arith.muli %15, %17 : vector<2x128xi32>
    %19 = vector.broadcast %14 : i32 to vector<2x128xi32>
    %20 = arith.addi %19, %18 : vector<2x128xi32>
    %c-1028477387_i32 = arith.constant -1028477387 : i32
    %21 = vector.broadcast %c-1028477387_i32 : i32 to vector<2x128xi32>
    %22 = arith.muli %16, %21 : vector<2x128xi32>
    %23 = arith.addi %20, %22 : vector<2x128xi32>
    %c16_i32 = arith.constant 16 : i32
    %24 = vector.broadcast %c16_i32 : i32 to vector<2x128xi32>
    %25 = arith.shrui %23, %24 : vector<2x128xi32>
    %26 = arith.xori %23, %25 : vector<2x128xi32>
    %c2146121005_i32 = arith.constant 2146121005 : i32
    %27 = vector.broadcast %c2146121005_i32 : i32 to vector<2x128xi32>
    %28 = arith.muli %26, %27 : vector<2x128xi32>
    %c15_i32 = arith.constant 15 : i32
    %29 = vector.broadcast %c15_i32 : i32 to vector<2x128xi32>
    %30 = arith.shrui %28, %29 : vector<2x128xi32>
    %31 = arith.xori %28, %30 : vector<2x128xi32>
    %c-2073254261_i32 = arith.constant -2073254261 : i32
    %32 = vector.broadcast %c-2073254261_i32 : i32 to vector<2x128xi32>
    %33 = arith.muli %31, %32 : vector<2x128xi32>
    %c16_i32_10 = arith.constant 16 : i32
    %34 = vector.broadcast %c16_i32_10 : i32 to vector<2x128xi32>
    %35 = arith.shrui %33, %34 : vector<2x128xi32>
    %36 = arith.xori %33, %35 : vector<2x128xi32>
    %c8388607_i32 = arith.constant 8388607 : i32
    %37 = vector.broadcast %c8388607_i32 : i32 to vector<2x128xi32>
    %38 = arith.andi %36, %37 : vector<2x128xi32>
    %c2516582_i32 = arith.constant 2516582 : i32
    %39 = vector.broadcast %c2516582_i32 : i32 to vector<2x128xi32>
    %40 = arith.cmpi uge, %38, %39 : vector<2x128xi32>
    %cst_11 = arith.constant 1.42857146 : f32
    %41 = vector.broadcast %cst_11 : f32 to vector<2x128xf32>
    %42 = arith.mulf %11, %41 : vector<2x128xf32>
    %cst_12 = arith.constant 0.000000e+00 : f32
    %43 = vector.broadcast %cst_12 : f32 to vector<2x128xf32>
    %44 = arith.select %40, %42, %43 : vector<2x128xi1>, vector<2x128xf32>
    %c0_13 = arith.constant 0 : index
    %c0_14 = arith.constant 0 : index
    %45 = vector.load %arg5[%c0_13, %c0_14] : memref<2x128xf32, #tpu.memory_space<vmem>>, vector<2x128xf32>
    tpu.vector_store %arg5[%c0_13, %c0_14], %44 {strides = array<i32>} : memref<2x128xf32, #tpu.memory_space<vmem>>, vector<2x128xf32>,
    return
  }
  func.func @transform_0(%arg0: i32, %arg1: memref<1xi32, #tpu.memory_space<smem>>) -> (i32, i32, i32) {
    %c0_i32 = arith.constant 0 : i32
    %c0_i32_0 = arith.constant 0 : i32
    %c0_i32_1 = arith.constant 0 : i32
    return %arg0, %c0_i32, %c0_i32_0 : i32, i32, i32
  }
  func.func @transform_1(%arg0: i32, %arg1: memref<1xi32, #tpu.memory_space<smem>>) -> (i32, i32) {
    %c0_i32 = arith.constant 0 : i32
    %c0_i32_0 = arith.constant 0 : i32
    %c0_i32_1 = arith.constant 0 : i32
    return %c0_i32, %c0_i32_0 : i32, i32
  }
  func.func @transform_2(%arg0: i32, %arg1: memref<1xi32, #tpu.memory_space<smem>>) -> (i32, i32) {
    %c0_i32 = arith.constant 0 : i32
    %c0_i32_0 = arith.constant 0 : i32
    %c0_i32_1 = arith.constant 0 : i32
    return %c0_i32, %c0_i32_0 : i32, i32
  }
  func.func @transform_3(%arg0: i32, %arg1: memref<1xi32, #tpu.memory_space<smem>>) -> (i32, i32) {
    %c0_i32 = arith.constant 0 : i32
    %c0_i32_0 = arith.constant 0 : i32
    return %arg0, %c0_i32 : i32, i32
  }
}

</mosaic_0001>

<bundles_post_ra>
// kernel: encoder_forward.1
= control target key start
LH: loop header
LB: loop body
LE: loop exit
PB: predicated region body
PF: predicated region fallthrough
CT: control target
= control target key end

     0   :  { %vm26_vm0 = vcmask 1042432   ;;  %s241_s0 = inlined_call_operand.<no memory space> [shape: s32[1], index: 0, kind: input, shape index: {}]   ;;  %s242_s1 = inlined_call_operand.vmem [shape: f32[2,3,256], index: 1, kind: input, shape index: {}]   ;;  %s243_s2 = inlined_call_operand.vmem [shape: bf16[3,128], index: 2, kind: input, shape index: {}]   ;;  %s244_s3 = inlined_call_operand.vmem [shape: f32[1,128], index: 3, kind: input, shape index: {}]   ;;  %s245_s4 = inlined_call_operand.hbm [shape: f32[2,128], index: 4, kind: output, shape index: {}]  }
   0x1   :  { %v18_v0 = vld [vmem:[%s242_s1] sm:$0x77]  ;;  %v19_v1 = vld [vmem:[%s242_s1 + $0x8] sm:$0x77] }
   0x2   :  { %v22_v2 = vcombine.high %v18_v0, %v18_v0  ;;  %v27_v3 = vsel %vm26_vm0, %v18_v0, 0.0  ;;  %v23_v4 = vcombine.high %v19_v1, %v19_v1 }
   0x3   :  { %10 = vsyncpa [#allocation5], 0  ;;  %v32_v6 = vsel %vm26_vm0, %v19_v1, 0.0  ;;  %vm71_vm1 = vcmask 1040384   ;;  %vm72_vm2 = vcmask 1041408   ;;  %v194_v10 = vmov 65535  }
   0x4   :  { %v28_v5 = vsel %vm26_vm0, %v22_v2, 0.0  ;;  %v33_v7 = vsel %vm26_vm0, %v23_v4, 0.0  ;;  %v73_v11 = vsel %vm71_vm1, 4294967295, %v194_v10  ;;  %v42_v12 = vld [vmem:[%s243_s2] sm:$0x3]  ;;  %v195_v15 = vmov 0.0  }
   0x5   :  { %v29_v8 = vadd.f32 %v28_v5, %v27_v3  ;;  %v34_v9 = vadd.f32 %v33_v7, %v32_v6  ;;  %v74_v13 = vsel %vm72_vm2, %v73_v11, 0  ;;  %160 = vmatprep.subr.bf16.mxu0 %v195_v15  ;;  %vm196_vm3 = vmmov 0   ;;  %v156_v45 = vld [vmem:[%s244_s3] ss:$0 sm:$0xff] }
   0x6   :  { %v76_v14 = vand.u32 %v74_v13, %v42_v12  ;;  %162 = vmatprep.mubr.msk.bf16.mxu0 %vm196_vm3, %v195_v15  ;;  %v54_v16 = vlaneseq  ;;  %vm64_vm4 = vcmask 1041409   ;;  %vm67_vm5 = vcmask 23552  }
   0x7   :  { %30 = vadd.xlane.f32.xlu0 %v29_v8  ;;  %v125_v33 = vstv %s241_s0  ;;  %s197_s0 = smov [#allocation4]  }
   0x8   :  { %161 = vmatpush3.bf16.msra.mxu0 %v76_v14  ;;  %v55_v19 = vand.u32 127, %v54_v16  ;;  %v57_v20 = vshrl.u32 %v54_v16, 7  ;;  %s148_s23 = sshll.u32 %s197_s0, 4  ;;  %s149_s23 = int_to_ptr.vmem [resolvable:$true] %s148_s23 }
   0x9   :  { %s172_s24 = scalar_lea.vmem %s149_s23, 32  ;;  %p177_p1 = scmp.lt.s32.totalorder %s149_s23, %s149_s23 }
   0xa   :  { %v58_v24 = vsub.s32 %v55_v19, %v57_v20  ;;  %v124_v32 = vmul.u32 2246822507, %v57_v20  ;;  %v127_v35 = vmul.u32 3266489909, %v55_v19  ;;  %p173_p0 = scmp.ne.s32.totalorder %s149_s23, %s172_s24  ;;  %p178_p2 = scmp.lt.s32.totalorder %s172_s24, %s172_s24 }
   0xb   :  { %35 = vadd.xlane.f32.xlu0 %v34_v9 }
   0xc   :  { %v126_v34 = vadd.s32 %v125_v33, %v124_v32  ;;  %p179_p3 = por %p178_p2, %p177_p1 }
   0xe   :  { %v128_v36 = vadd.s32 %v127_v35, %v126_v34  ;;  %p180_p4 = pnand %p179_p3, %p173_p0 }
  0x10   :  { %v129_v37 = vshrl.u32 %v128_v36, 16 }
  0x12   :  { %v130_v38 = vxor.u32 %v129_v37, %v128_v36 }
  0x14   :  { %v131_v39 = vmul.u32 2146121005, %v130_v38 }
  0x16   :  { %v132_v40 = vshrl.u32 %v131_v39, 15 }
  0x18   :  { %v133_v41 = vxor.u32 %v132_v40, %v131_v39 }
  0x1a   :  { %v134_v42 = vmul.u32 2221713035, %v133_v41 }
  0x1c   :  { %v135_v43 = vshrl.u32 %v134_v42, 16 }
  0x1e   :  { %v136_v44 = vxor.u32 %v135_v43, %v134_v42 }
  0x20   :  { %v137_v47 = vand.u32 8388607, %v136_v44 }
  0x22   :  { %vm138_vm6 = vcmp.ge.u32.totalorder %v137_v47, 2516582 }
  0x90   :  { %v31_v17 = vpop.xlane.xlu0 %30 }
  0x91   :  { %v38_v18 = vmul.f32 0.00390625, %v31_v17 }
  0x93   :  { %v40_v21 = vpack.c.bf16 %v38_v18, %v38_v18 }
  0x94   :  { %v36_v22 = vpop.xlane.xlu0 %35 }
  0x95   :  { %v39_v23 = vmul.f32 0.00390625, %v36_v22  ;;  %v52_v25 = vunpack.c.l.b16 %v40_v21 }
  0x97   :  { %v41_v26 = vpack.c.bf16 %v39_v23, %v39_v23  ;;  %v59_v28 = vrot.slane %v52_v25, %v58_v24 }
  0x99   :  { %v53_v27 = vunpack.c.l.b16 %v41_v26 }
  0x9b   :  { %v63_v29 = vrot.slane %v53_v27, %v58_v24 }
  0x9d   :  { %v65_v30 = vsel %vm64_vm4, %v63_v29, %v59_v28 }
  0x9e   :  { %v66_v31 = vpack.c.b16 %v65_v30, %v65_v30 }
  0xa0   :  { %163 = vmatmul.mubr.msk.bf16.vlgmr.msra.gmra.mxu0 %vm67_vm5, %v66_v31 }
 0x160   :  { %v112_v46 = vpop.f32.mrf.mxu0 }
 0x161   :  { %v113_v48 = vadd.f32 %v156_v45, %v112_v46 }
 0x162   :  { %v164_v49 = vpop.f32.mrf.mxu0 }
 0x163   :  { %v118_v50 = vmax.f32 %v113_v48, 0.0 }
 0x164   :  { %v115_v51 = vpop.f32.mrf.mxu0 }
 0x165   :  { %v139_v52 = vmul.f32 1.4285715, %v118_v50 }
 0x166   :  { %v165_v53 = vpop.f32.mrf.mxu0 }
 0x167   :  { %v140_v54 = vsel %vm138_vm6, %v139_v52, 0.0 }
 0x168   :  { %141 = vst [vmem:[#allocation4] sm:$0x3] %v140_v54 }
 0x169   :  { %183 = shalt.err (!%p180_p4)
}
 0x16a   :  { %151 = dma.vmem_to_hbm [thread:$0]  %s149_s23, 32, %s245_s4, [#allocation5]  }
 0x16b   :  { %192 = dma.done.wait [#allocation5], 32  }
 0x16c   :  { %193 = vsyncadd [#allocation5], 4294967264 }
 0x16d   :  { %155 = vsyncpa [#allocation5], 1 }

</bundles_post_ra>
